<compile_context>
chip_gen: v6e
topology: v6e:2x2x1
jax: 0.10.0
libtpu: 0.0.40
codegen_flags: <defaults>
</compile_context>

<pallas_src>
import functools

import jax
import jax.numpy as jnp
from jax.experimental import pallas as pl
from jax.experimental.pallas import tpu as pltpu


def _round_up(n, m):
    return (n + m - 1) // m * m


def _gelu_tanh(x):
    # GELU, tanh approximation (matches torch.nn.GELU(approximate='tanh')).
    c = jnp.float32(0.7978845608028654)  # sqrt(2/pi)
    return 0.5 * x * (1.0 + jnp.tanh(c * (x + 0.044715 * x * x * x)))


@functools.lru_cache(maxsize=1)
def _chip_presets():
    """Per-TPU-generation (tm, th, vmem_limit_cap_bytes) presets."""
    kind = ""
    try:
        kind = jax.devices()[0].device_kind.lower()
    except Exception:
        pass
    vmem_cap = None
    try:
        vmem_cap = int(pltpu.get_tpu_info().vmem_capacity_bytes)
    except Exception:
        pass
    small_vmem = vmem_cap is not None and vmem_cap <= 64 * 1024 * 1024
    if "v7" in kind or small_vmem:
        # v7x: 64 MiB VMEM/TC -> smaller token tile, conservative clamp.
        return 256, 512, 56 * 1024 * 1024
    if "v5e" in kind or "v5 lite" in kind or "v5lite" in kind:
        # v5e balance point ~240 FLOP/byte; keep tiles small, well clear of the
        # small scoped-VMEM default while the 4x128^2 MXU stays full-width.
        return 256, 256, 100 * 1024 * 1024
    # v6e (and other 128 MiB chips): big token tile so per-token-tile weight
    # re-streaming stays above the ~650 FLOP/byte balance point.
    return 1024, 512, 100 * 1024 * 1024


def _largest_aligned_divisor(total, preferred, align):
    """Largest multiple of `align` that divides `total` and is <= preferred."""
    best = align
    t = align
    limit = min(preferred, total)
    while t <= limit:
        if total % t == 0:
            best = t
        t += align
    return best


def _mlp_kernel(x_ref, w1_ref, b1_ref, w2_ref, b2_ref, o_ref, *scratch,
                activation):
    # Grid: (token_tiles, hidden_tiles). The hidden axis is the reduction of
    # the second matmul; the accumulator (output block or scratch) is resident
    # across it because its block index ignores j.
    acc_ref = scratch[0] if scratch else o_ref
    j = pl.program_id(1)

    # First matmul in the operands' native dtype (bf16 stays bf16 on the MXU),
    # f32 accumulation; bias add + activation in f32 (v5e EUP has no bf16).
    h = jnp.dot(x_ref[...], w1_ref[...], preferred_element_type=jnp.float32)
    h = h + b1_ref[...]                                     # (1, th) f32
    if activation == "GELU":
        h = _gelu_tanh(h)
    else:  # ReLU
        h = jnp.maximum(h, 0.0)

    # Second matmul: cast activation back to the weight dtype (no-op for f32).
    y = jnp.dot(h.astype(w2_ref.dtype), w2_ref[...],
                preferred_element_type=jnp.float32)

    @pl.when(j == 0)
    def _():
        acc_ref[...] = y.astype(acc_ref.dtype)   # direct write, no zero-init

    @pl.when(j > 0)
    def _():
        acc_ref[...] += y.astype(acc_ref.dtype)

    @pl.when(j == pl.num_programs(1) - 1)
    def _():
        o_ref[...] = (acc_ref[...].astype(jnp.float32)
                      + b2_ref[...]).astype(o_ref.dtype)


@functools.partial(jax.jit,
                   static_argnames=("tm", "th", "activation", "vmem_cap"))
def _mlp_pallas_impl(x, w1, b1, w2, b2, *, tm, th, activation, vmem_cap):
    M, D = x.shape
    H = w1.shape[1]

    # Lane-dense feature/hidden dims (pad only if not already 128-aligned).
    Dp = _round_up(D, 128)
    Hp = _round_up(H, 128)

    # Sublane packing of the token axis: 8 rows (f32), 16 (bf16), 32 (int8).
    row_align = {4: 8, 2: 16, 1: 32}.get(jnp.dtype(x.dtype).itemsize, 8)
    Mp = _round_up(M, row_align)

    # Token tile: clamp to the padded token count, keep it sublane-aligned, and
    # guarantee >=2 tiles when there is enough work so the "parallel" axis can
    # be sharded across TensorCores (v7x megacore).
    tm_eff = min(tm, Mp)
    if tm_eff < Mp:
        tm_eff = max(row_align, tm_eff // row_align * row_align)
    if pl.cdiv(Mp, tm_eff) == 1 and Mp >= 256:
        tm_eff = _round_up(pl.cdiv(Mp, 2), row_align)

    # Hidden tile: largest 128-multiple divisor of Hp -> no extra H padding.
    th_eff = _largest_aligned_divisor(Hp, th, 128)

    def pad2(a, r, c):
        return a if a.shape == (r, c) else jnp.pad(
            a, ((0, r - a.shape[0]), (0, c - a.shape[1])))

    # Zero padding is numerically exact: padded hidden columns give GELU(0)=0
    # which hit zero rows of W2; padded token rows / output columns are sliced
    # off (the ragged last token tile is masked at writeback).
    xp = pad2(x, Mp, Dp)
    w1p = pad2(w1, Dp, Hp)
    w2p = pad2(w2, Hp, Dp)
    b1p = pad2(b1.astype(jnp.float32).reshape(1, H), 1, Hp)
    b2p = pad2(b2.astype(jnp.float32).reshape(1, D), 1, Dp)

    # f32 I/O accumulates directly into the resident output block; a separate
    # f32 VMEM accumulator only when the output dtype is narrower.
    use_acc_scratch = jnp.dtype(x.dtype) != jnp.float32
    scratch_shapes = ([pltpu.VMEM((tm_eff, Dp), jnp.float32)]
                      if use_acc_scratch else [])

    # VMEM budget from the actual tile footprint with headroom, per-gen cap.
    isz = jnp.dtype(x.dtype).itemsize
    wsz = jnp.dtype(w1.dtype).itemsize
    vmem_bytes = (
        2 * tm_eff * Dp * isz              # x tiles (double buffered)
        + 2 * Dp * th_eff * wsz            # w1 H-slices
        + 2 * th_eff * Dp * wsz            # w2 H-slices
        + 2 * (th_eff + Dp) * 4            # bias slices
        + 2 * tm_eff * Dp * isz            # output tiles
        + (tm_eff * Dp * 4 if use_acc_scratch else 0)
        + tm_eff * th_eff * 4              # f32 activation tile
    )
    vmem_limit = min(max(int(vmem_bytes * 1.5), 32 * 1024 * 1024), vmem_cap)

    grid = (pl.cdiv(Mp, tm_eff), Hp // th_eff)

    out = pl.pallas_call(
        functools.partial(_mlp_kernel, activation=activation),
        out_shape=jax.ShapeDtypeStruct((Mp, Dp), x.dtype),
        grid_spec=pltpu.PrefetchScalarGridSpec(
            num_scalar_prefetch=0,
            grid=grid,
            in_specs=[
                pl.BlockSpec((tm_eff, Dp), lambda i, j: (i, 0)),   # x tile
                pl.BlockSpec((Dp, th_eff), lambda i, j: (0, j)),   # w1 H-slice
                pl.BlockSpec((1, th_eff), lambda i, j: (0, j)),    # b1 slice
                pl.BlockSpec((th_eff, Dp), lambda i, j: (j, 0)),   # w2 H-slice
                pl.BlockSpec((1, Dp), lambda i, j: (0, 0)),        # b2
            ],
            out_specs=pl.BlockSpec((tm_eff, Dp), lambda i, j: (i, 0)),
            scratch_shapes=scratch_shapes,
        ),
        compiler_params=pltpu.CompilerParams(
            dimension_semantics=("parallel", "arbitrary"),
            vmem_limit_bytes=vmem_limit,
        ),
    )(xp, w1p, b1p, w2p, b2p)
    return out[:M, :D]


def mlp_pallas(x, w1, b1, w2, b2, *, activation="GELU", tm=None, th=None):
    """x: [M, D]; w1=[D,H] (c_fc.weight.T); b1=[H]; w2=[H,D] (c_proj.weight.T); b2=[D]."""
    if activation not in ("GELU", "ReLU"):
        raise ValueError(f"Invalid activation function: {activation}.")
    ptm, pth, vmem_cap = _chip_presets()
    return _mlp_pallas_impl(x, w1, b1, w2, b2,
                            tm=int(tm or ptm), th=int(th or pth),
                            activation=activation, vmem_cap=vmem_cap)


def mlp_reference(x, w1, b1, w2, b2, activation="GELU"):
    h = x.astype(jnp.float32) @ w1.astype(jnp.float32) + b1.astype(jnp.float32)
    h = _gelu_tanh(h) if activation == "GELU" else jnp.maximum(h, 0.0)
    return h @ w2.astype(jnp.float32) + b2.astype(jnp.float32)


if __name__ == "__main__":
    # Module config: d_model=32, mlp_hidden_dim=128, activation='GELU'.
    B, S, D, H = 2, 8, 32, 128
    key = jax.random.PRNGKey(0)
    kx, k1, kb1, k2, kb2 = jax.random.split(key, 5)

    x = jax.random.normal(kx, (B, S, D), dtype=jnp.float32)
    w1 = jax.random.normal(k1, (D, H), dtype=jnp.float32) * 0.02   # c_fc.weight.T
    b1 = jax.random.normal(kb1, (H,), dtype=jnp.float32) * 0.02    # c_fc.bias
    w2 = jax.random.normal(k2, (H, D), dtype=jnp.float32) * 0.02   # c_proj.weight.T
    b2 = jax.random.normal(kb2, (D,), dtype=jnp.float32) * 0.02    # c_proj.bias

    x2d = x.reshape(B * S, D)
    out = jax.block_until_ready(mlp_pallas(x2d, w1, b1, w2, b2))
    ref = mlp_reference(x2d, w1, b1, w2, b2)
    assert jnp.allclose(out, ref, atol=2e-4, rtol=2e-4), "mismatch vs reference"

    # Ragged M + non-128 D + multi-step hidden reduction (accumulate path).
    M2, D2, H2 = 20, 48, 320
    kx2, k12, kb12, k22, kb22 = jax.random.split(jax.random.PRNGKey(1), 5)
    x2 = jax.random.normal(kx2, (M2, D2), dtype=jnp.float32)
    w12 = jax.random.normal(k12, (D2, H2), dtype=jnp.float32) * 0.02
    b12 = jax.random.normal(kb12, (H2,), dtype=jnp.float32) * 0.02
    w22 = jax.random.normal(k22, (H2, D2), dtype=jnp.float32) * 0.02
    b22 = jax.random.normal(kb22, (D2,), dtype=jnp.float32) * 0.02
    out2 = jax.block_until_ready(
        mlp_pallas(x2, w12, b12, w22, b22, tm=16, th=128))
    ref2 = mlp_reference(x2, w12, b12, w22, b22)
    assert jnp.allclose(out2, ref2, atol=2e-4, rtol=2e-4), "mismatch (tiled path)"

    # bf16 path (separate f32 scratch accumulator, bf16 MXU), loose tolerance.
    to_bf16 = lambda a: a.astype(jnp.bfloat16)
    out3 = jax.block_until_ready(
        mlp_pallas(to_bf16(x2d), to_bf16(w1), to_bf16(b1),
                   to_bf16(w2), to_bf16(b2)))
    ref3 = mlp_reference(to_bf16(x2d), to_bf16(w1), to_bf16(b1),
                         to_bf16(w2), to_bf16(b2))
    assert jnp.allclose(out3.astype(jnp.float32), ref3,
                        atol=1.5e-2, rtol=5e-2), "mismatch (bf16 path)"

    print("KERNEL_OK")
</pallas_src>

<mosaic_0001>
module attributes {stable_mosaic.version = 11 : i64} {
  func.func @_mlp_kernel(%arg0: i32, %arg1: i32, %arg2: memref<16x128xf32, #tpu.memory_space<vmem>>, %arg3: memref<128x128xf32, #tpu.memory_space<vmem>>, %arg4: memref<1x128xf32, #tpu.memory_space<vmem>>, %arg5: memref<128x128xf32, #tpu.memory_space<vmem>>, %arg6: memref<1x128xf32, #tpu.memory_space<vmem>>, %arg7: memref<16x128xf32, #tpu.memory_space<vmem>>) attributes {dimension_semantics = [#tpu.dimension_semantics<parallel>, #tpu.dimension_semantics<arbitrary>], iteration_bounds = array<i64: 1, 1>, scalar_prefetch = 0 : i64, scratch_operands = 0 : i64, tpu.core_type = #tpu.core_type<tc>, window_params = [{transform_indices = @transform_0, window_bounds = array<i64: 16, 128>}, {transform_indices = @transform_1, window_bounds = array<i64: 128, 128>}, {transform_indices = @transform_2, window_bounds = array<i64: 1, 128>}, {transform_indices = @transform_3, window_bounds = array<i64: 128, 128>}, {pipeline_mode = #tpu.pipeline_mode<synchronous>, transform_indices = @transform_4, window_bounds = array<i64: 1, 128>}, {transform_indices = @transform_5, window_bounds = array<i64: 16, 128>}]} {
    %c0 = arith.constant 0 : index
    %c0_0 = arith.constant 0 : index
    %0 = vector.load %arg2[%c0, %c0_0] : memref<16x128xf32, #tpu.memory_space<vmem>>, vector<16x128xf32>
    %c0_1 = arith.constant 0 : index
    %c0_2 = arith.constant 0 : index
    %1 = vector.load %arg3[%c0_1, %c0_2] : memref<128x128xf32, #tpu.memory_space<vmem>>, vector<128x128xf32>
    %cst = arith.constant dense<0.000000e+00> : vector<16x128xf32>
    %2 = tpu.matmul %0, %1, %cst {dimension_numbers = #tpu.dot_dimension_numbers<[1], [0], [0], [1], [0, 0, 1, 1], [], []>} : vector<16x128xf32>, vector<128x128xf32>, vector<16x128xf32> -> vector<16x128xf32>
    %c0_3 = arith.constant 0 : index
    %c0_4 = arith.constant 0 : index
    %3 = vector.load %arg4[%c0_3, %c0_4] : memref<1x128xf32, #tpu.memory_space<vmem>>, vector<1x128xf32>
    %4 = vector.broadcast %3 : vector<1x128xf32> to vector<16x128xf32>
    %5 = arith.addf %2, %4 : vector<16x128xf32>
    %cst_5 = arith.constant 5.000000e-01 : f32
    %6 = vector.broadcast %cst_5 : f32 to vector<16x128xf32>
    %7 = arith.mulf %6, %5 : vector<16x128xf32>
    %cst_6 = arith.constant 4.471500e-02 : f32
    %8 = vector.broadcast %cst_6 : f32 to vector<16x128xf32>
    %9 = arith.mulf %8, %5 : vector<16x128xf32>
    %10 = arith.mulf %9, %5 : vector<16x128xf32>
    %11 = arith.mulf %10, %5 : vector<16x128xf32>
    %12 = arith.addf %5, %11 : vector<16x128xf32>
    %cst_7 = arith.constant 0.797884583 : f32
    %13 = vector.broadcast %cst_7 : f32 to vector<16x128xf32>
    %14 = arith.mulf %13, %12 : vector<16x128xf32>
    %15 = math.tanh %14 : vector<16x128xf32>
    %cst_8 = arith.constant 1.000000e+00 : f32
    %16 = vector.broadcast %cst_8 : f32 to vector<16x128xf32>
    %17 = arith.addf %16, %15 : vector<16x128xf32>
    %18 = arith.mulf %7, %17 : vector<16x128xf32>
    %c0_9 = arith.constant 0 : index
    %c0_10 = arith.constant 0 : index
    %19 = vector.load %arg5[%c0_9, %c0_10] : memref<128x128xf32, #tpu.memory_space<vmem>>, vector<128x128xf32>
    %cst_11 = arith.constant dense<0.000000e+00> : vector<16x128xf32>
    %20 = tpu.matmul %18, %19, %cst_11 {dimension_numbers = #tpu.dot_dimension_numbers<[1], [0], [0], [1], [0, 0, 1, 1], [], []>} : vector<16x128xf32>, vector<128x128xf32>, vector<16x128xf32> -> vector<16x128xf32>
    %c0_i32 = arith.constant 0 : i32
    %21 = arith.cmpi eq, %arg1, %c0_i32 : i32
    %22 = arith.extui %21 : i1 to i32
    %c0_i32_12 = arith.constant 0 : i32
    %23 = arith.cmpi ne, %22, %c0_i32_12 : i32
    scf.if %23 {
      %c0_17 = arith.constant 0 : index
      %c0_18 = arith.constant 0 : index
      %30 = vector.load %arg7[%c0_17, %c0_18] : memref<16x128xf32, #tpu.memory_space<vmem>>, vector<16x128xf32>
      tpu.vector_store %arg7[%c0_17, %c0_18], %20 {strides = array<i32>} : memref<16x128xf32, #tpu.memory_space<vmem>>, vector<16x128xf32>,
    } else {
    }
    %c0_i32_13 = arith.constant 0 : i32
    %24 = arith.cmpi sgt, %arg1, %c0_i32_13 : i32
    %25 = arith.extui %24 : i1 to i32
    %c0_i32_14 = arith.constant 0 : i32
    %26 = arith.cmpi ne, %25, %c0_i32_14 : i32
    scf.if %26 {
      %c0_17 = arith.constant 0 : index
      %c0_18 = arith.constant 0 : index
      %30 = vector.load %arg7[%c0_17, %c0_18] : memref<16x128xf32, #tpu.memory_space<vmem>>, vector<16x128xf32>
      %31 = arith.addf %30, %20 : vector<16x128xf32>
      %c0_19 = arith.constant 0 : index
      %c0_20 = arith.constant 0 : index
      %32 = vector.load %arg7[%c0_19, %c0_20] : memref<16x128xf32, #tpu.memory_space<vmem>>, vector<16x128xf32>
      tpu.vector_store %arg7[%c0_19, %c0_20], %31 {strides = array<i32>} : memref<16x128xf32, #tpu.memory_space<vmem>>, vector<16x128xf32>,
    } else {
    }
    %c0_i32_15 = arith.constant 0 : i32
    %27 = arith.cmpi eq, %arg1, %c0_i32_15 : i32
    %28 = arith.extui %27 : i1 to i32
    %c0_i32_16 = arith.constant 0 : i32
    %29 = arith.cmpi ne, %28, %c0_i32_16 : i32
    scf.if %29 {
      %c0_17 = arith.constant 0 : index
      %c0_18 = arith.constant 0 : index
      %30 = vector.load %arg7[%c0_17, %c0_18] : memref<16x128xf32, #tpu.memory_space<vmem>>, vector<16x128xf32>
      %c0_19 = arith.constant 0 : index
      %c0_20 = arith.constant 0 : index
      %31 = vector.load %arg6[%c0_19, %c0_20] : memref<1x128xf32, #tpu.memory_space<vmem>>, vector<1x128xf32>
      %32 = vector.broadcast %31 : vector<1x128xf32> to vector<16x128xf32>
      %33 = arith.addf %30, %32 : vector<16x128xf32>
      %c0_21 = arith.constant 0 : index
      %c0_22 = arith.constant 0 : index
      %34 = vector.load %arg7[%c0_21, %c0_22] : memref<16x128xf32, #tpu.memory_space<vmem>>, vector<16x128xf32>
      tpu.vector_store %arg7[%c0_21, %c0_22], %33 {strides = array<i32>} : memref<16x128xf32, #tpu.memory_space<vmem>>, vector<16x128xf32>,
    } else {
    }
    return
  }
  func.func @transform_0(%arg0: i32, %arg1: i32) -> (i32, i32) {
    %c0_i32 = arith.constant 0 : i32
    %c0_i32_0 = arith.constant 0 : i32
    return %arg0, %c0_i32 : i32, i32
  }
  func.func @transform_1(%arg0: i32, %arg1: i32) -> (i32, i32) {
    %c0_i32 = arith.constant 0 : i32
    %c0_i32_0 = arith.constant 0 : i32
    return %c0_i32, %arg1 : i32, i32
  }
  func.func @transform_2(%arg0: i32, %arg1: i32) -> (i32, i32) {
    %c0_i32 = arith.constant 0 : i32
    %c0_i32_0 = arith.constant 0 : i32
    return %c0_i32, %arg1 : i32, i32
  }
  func.func @transform_3(%arg0: i32, %arg1: i32) -> (i32, i32) {
    %c0_i32 = arith.constant 0 : i32
    %c0_i32_0 = arith.constant 0 : i32
    return %arg1, %c0_i32 : i32, i32
  }
  func.func @transform_4(%arg0: i32, %arg1: i32) -> (i32, i32) {
    %c0_i32 = arith.constant 0 : i32
    %c0_i32_0 = arith.constant 0 : i32
    %c0_i32_1 = arith.constant 0 : i32
    return %c0_i32, %c0_i32_0 : i32, i32
  }
  func.func @transform_5(%arg0: i32, %arg1: i32) -> (i32, i32) {
    %c0_i32 = arith.constant 0 : i32
    %c0_i32_0 = arith.constant 0 : i32
    return %arg0, %c0_i32 : i32, i32
  }
}

</mosaic_0001>

<bundles_post_ra>
// kernel: _mlp_pallas_impl.1
= control target key start
LH: loop header
LB: loop body
LE: loop exit
PB: predicated region body
PF: predicated region fallthrough
CT: control target
= control target key end

     0   :  { %s559_s0 = inlined_call_operand.vmem [shape: f32[16,128], index: 0, kind: input, shape index: {}]   ;;  %s560_s1 = inlined_call_operand.vmem [shape: f32[128,128], index: 1, kind: input, shape index: {}]   ;;  %s561_s2 = inlined_call_operand.vmem [shape: f32[1,128], index: 2, kind: input, shape index: {}]   ;;  %s562_s3 = inlined_call_operand.vmem [shape: f32[128,128], index: 3, kind: input, shape index: {}]   ;;  %s563_s4 = inlined_call_operand.vmem [shape: f32[1,128], index: 4, kind: input, shape index: {}]   ;;  %s564_s5 = inlined_call_operand.hbm [shape: f32[16,128], index: 5, kind: output, shape index: {}]  }
   0x1   :  { %v38_v0 = vld [vmem:[%s560_s1 + $0x78] sm:$0xff]  ;;  %v37_v1 = vld [vmem:[%s560_s1 + $0x70] sm:$0xff]  ;;  %v36_v2 = vld [vmem:[%s560_s1 + $0x68] sm:$0xff] }
   0x2   :  { %316 = vmatprep.subr.mxu0 %v38_v0  ;;  %v35_v3 = vld [vmem:[%s560_s1 + $0x60] sm:$0xff]  ;;  %v34_v5 = vld [vmem:[%s560_s1 + $0x58] sm:$0xff] }
   0x3   :  { %317 = vmatpush3.msra.mxu0 %v38_v0  ;;  %v21_v4 = vld [vmem:[%s559_s0] sm:$0xff] }
   0x4   :  { %318 = vmatprep.subr.mxu0 %v37_v1  ;;  %348 = vmatprep.mubr.f32.mxu0 %v21_v4 }
   0x5   :  { %319 = vmatpush3.msra.mxu0 %v37_v1 }
   0x6   :  { %320 = vmatprep.subr.mxu0 %v36_v2 }
   0x7   :  { %321 = vmatpush3.msra.mxu0 %v36_v2 }
   0x8   :  { %10 = vsyncpa [#allocation3], 0  ;;  %322 = vmatprep.subr.mxu0 %v35_v3  ;;  %v33_v6 = vld [vmem:[%s560_s1 + $0x50] sm:$0xff]  ;;  %v32_v7 = vld [vmem:[%s560_s1 + $0x48] sm:$0xff]  ;;  %s415_s9 = smov [#allocation2]  }
   0x9   :  { %323 = vmatpush3.msra.mxu0 %v35_v3  ;;  %v31_v8 = vld [vmem:[%s560_s1 + $0x40] sm:$0xff]  ;;  %v30_v9 = vld [vmem:[%s560_s1 + $0x38] sm:$0xff]  ;;  %v29_v10 = vld [vmem:[%s560_s1 + $0x30] sm:$0xff]  ;;  %s267_s10 = sshll.u32 %s415_s9, 4  ;;  %s268_s10 = int_to_ptr.vmem [resolvable:$true] %s267_s10 }
   0xa   :  { %324 = vmatprep.subr.mxu0 %v34_v5  ;;  %v28_v11 = vld [vmem:[%s560_s1 + $0x28] sm:$0xff]  ;;  %v27_v12 = vld [vmem:[%s560_s1 + $0x20] sm:$0xff]  ;;  %v26_v13 = vld [vmem:[%s560_s1 + $0x18] sm:$0xff]  ;;  %s393_s11 = scalar_lea.vmem %s268_s10, 256  ;;  %p398_p1 = scmp.lt.s32.totalorder %s268_s10, %s268_s10 }
   0xb   :  { %325 = vmatpush3.msra.mxu0 %v34_v5  ;;  %v25_v14 = vld [vmem:[%s560_s1 + $0x10] sm:$0xff]  ;;  %v24_v15 = vld [vmem:[%s560_s1 + $0x8] sm:$0xff]  ;;  %v23_v16 = vld [vmem:[%s560_s1] sm:$0xff]  ;;  %p394_p0 = scmp.ne.s32.totalorder %s268_s10, %s393_s11  ;;  %p399_p2 = scmp.lt.s32.totalorder %s393_s11, %s393_s11 }
   0xc   :  { %326 = vmatprep.subr.mxu0 %v33_v6  ;;  %v22_v17 = vld [vmem:[%s559_s0 + $0x8] sm:$0xff]  ;;  %v154_v18 = vld [vmem:[%s562_s3 + $0x78] sm:$0xff]  ;;  %v153_v19 = vld [vmem:[%s562_s3 + $0x70] sm:$0xff] }
   0xd   :  { %327 = vmatpush3.msra.mxu0 %v33_v6  ;;  %351 = vmatprep.subr.mxu1 %v154_v18  ;;  %v152_v20 = vld [vmem:[%s562_s3 + $0x68] sm:$0xff]  ;;  %v151_v21 = vld [vmem:[%s562_s3 + $0x60] sm:$0xff]  ;;  %v150_v22 = vld [vmem:[%s562_s3 + $0x58] sm:$0xff]  ;;  %p400_p3 = por %p399_p2, %p398_p1 }
   0xe   :  { %328 = vmatprep.subr.mxu0 %v32_v7  ;;  %352 = vmatpush3.msra.mxu1 %v154_v18  ;;  %v149_v23 = vld [vmem:[%s562_s3 + $0x50] sm:$0xff]  ;;  %v148_v24 = vld [vmem:[%s562_s3 + $0x48] sm:$0xff]  ;;  %v147_v25 = vld [vmem:[%s562_s3 + $0x40] sm:$0xff] }
   0xf   :  { %329 = vmatpush3.msra.mxu0 %v32_v7  ;;  %353 = vmatprep.subr.mxu1 %v153_v19  ;;  %v146_v26 = vld [vmem:[%s562_s3 + $0x38] sm:$0xff]  ;;  %v145_v27 = vld [vmem:[%s562_s3 + $0x30] sm:$0xff]  ;;  %v144_v28 = vld [vmem:[%s562_s3 + $0x28] sm:$0xff]  ;;  %p401_p4 = pnand %p400_p3, %p394_p0 }
  0x10   :  { %330 = vmatprep.subr.mxu0 %v31_v8  ;;  %354 = vmatpush3.msra.mxu1 %v153_v19  ;;  %v143_v29 = vld [vmem:[%s562_s3 + $0x20] sm:$0xff]  ;;  %v142_v30 = vld [vmem:[%s562_s3 + $0x18] sm:$0xff]  ;;  %v141_v31 = vld [vmem:[%s562_s3 + $0x10] sm:$0xff] }
  0x11   :  { %331 = vmatpush3.msra.mxu0 %v31_v8  ;;  %355 = vmatprep.subr.mxu1 %v152_v20  ;;  %v140_v32 = vld [vmem:[%s562_s3 + $0x8] sm:$0xff]  ;;  %v139_v33 = vld [vmem:[%s562_s3] sm:$0xff] }
  0x12   :  { %332 = vmatprep.subr.mxu0 %v30_v9  ;;  %356 = vmatpush3.msra.mxu1 %v152_v20  ;;  %v278_v34 = vld [vmem:[%s561_s2] ss:$0 sm:$0xff] }
  0x13   :  { %333 = vmatpush3.msra.mxu0 %v30_v9  ;;  %357 = vmatprep.subr.mxu1 %v151_v21  ;;  %v279_v57 = vld [vmem:[%s563_s4] ss:$0 sm:$0xff] }
  0x14   :  { %334 = vmatprep.subr.mxu0 %v29_v10  ;;  %358 = vmatpush3.msra.mxu1 %v151_v21 }
  0x15   :  { %335 = vmatpush3.msra.mxu0 %v29_v10  ;;  %359 = vmatprep.subr.mxu1 %v150_v22 }
  0x16   :  { %336 = vmatprep.subr.mxu0 %v28_v11  ;;  %360 = vmatpush3.msra.mxu1 %v150_v22 }
  0x17   :  { %337 = vmatpush3.msra.mxu0 %v28_v11  ;;  %361 = vmatprep.subr.mxu1 %v149_v23 }
  0x18   :  { %338 = vmatprep.subr.mxu0 %v27_v12  ;;  %362 = vmatpush3.msra.mxu1 %v149_v23 }
  0x19   :  { %339 = vmatpush3.msra.mxu0 %v27_v12  ;;  %363 = vmatprep.subr.mxu1 %v148_v24 }
  0x1a   :  { %340 = vmatprep.subr.mxu0 %v26_v13  ;;  %364 = vmatpush3.msra.mxu1 %v148_v24 }
  0x1b   :  { %341 = vmatpush3.msra.mxu0 %v26_v13  ;;  %365 = vmatprep.subr.mxu1 %v147_v25 }
  0x1c   :  { %342 = vmatprep.subr.mxu0 %v25_v14  ;;  %366 = vmatpush3.msra.mxu1 %v147_v25 }
  0x1d   :  { %343 = vmatpush3.msra.mxu0 %v25_v14  ;;  %367 = vmatprep.subr.mxu1 %v146_v26 }
  0x1e   :  { %344 = vmatprep.subr.mxu0 %v24_v15  ;;  %368 = vmatpush3.msra.mxu1 %v146_v26 }
  0x1f   :  { %345 = vmatpush3.msra.mxu0 %v24_v15  ;;  %369 = vmatprep.subr.mxu1 %v145_v27 }
  0x20   :  { %346 = vmatprep.subr.mxu0 %v23_v16  ;;  %370 = vmatpush3.msra.mxu1 %v145_v27 }
  0x21   :  { %347 = vmatpush3.msra.mxu0 %v23_v16  ;;  %371 = vmatprep.subr.mxu1 %v144_v28 }
  0x22   :  { %349 = vmatmul.mubr.f32.vlgmr.msra.gmra.mxu0 %v22_v17  ;;  %372 = vmatpush3.msra.mxu1 %v144_v28 }
  0x23   :  { %373 = vmatprep.subr.mxu1 %v143_v29 }
  0x24   :  { %374 = vmatpush3.msra.mxu1 %v143_v29 }
  0x25   :  { %375 = vmatprep.subr.mxu1 %v142_v30 }
  0x26   :  { %376 = vmatpush3.msra.mxu1 %v142_v30 }
  0x27   :  { %377 = vmatprep.subr.mxu1 %v141_v31 }
  0x28   :  { %378 = vmatpush3.msra.mxu1 %v141_v31 }
  0x29   :  { %379 = vmatprep.subr.mxu1 %v140_v32 }
  0x2a   :  { %380 = vmatpush3.msra.mxu1 %v140_v32 }
  0x2b   :  { %381 = vmatprep.subr.mxu1 %v139_v33 }
  0x2c   :  { %382 = vmatpush3.msra.mxu1 %v139_v33 }
  0xe2   :  { %v350_v35 = vpop.f32.mrf.mxu0 }
  0xe3   :  { %v118_v36 = vadd.f32 %v350_v35, %v278_v34 }
  0xe4   :  { %v112_v37 = vpop.f32.mrf.mxu0 }
  0xe5   :  { %v124_v38 = vmul.f32 0.044715, %v118_v36  ;;  %v113_v39 = vadd.f32 %v278_v34, %v112_v37  ;;  %v122_v54 = vmul.f32 0.5, %v118_v36 }
  0xe7   :  { %v126_v40 = vmul.f32 %v124_v38, %v118_v36  ;;  %v123_v41 = vmul.f32 0.044715, %v113_v39  ;;  %v121_v52 = vmul.f32 0.5, %v113_v39 }
  0xe9   :  { %v125_v42 = vmul.f32 %v123_v41, %v113_v39  ;;  %v128_v43 = vmul.f32 %v126_v40, %v118_v36 }
  0xeb   :  { %v127_v44 = vmul.f32 %v125_v42, %v113_v39  ;;  %v130_v45 = vadd.f32 %v128_v43, %v118_v36 }
  0xed   :  { %v129_v46 = vadd.f32 %v127_v44, %v113_v39  ;;  %v132_v47 = vmul.f32 0.7978846, %v130_v45 }
  0xef   :  { %v131_v48 = vmul.f32 0.7978846, %v129_v46  ;;  %389 = vtanh.f32 %v132_v47 }
  0xf1   :  { %391 = vtanh.f32 %v131_v48 }
  0xfc   :  { %v390_v49 = vpop.eup %389 }
  0xfd   :  { %v136_v51 = vadd.f32 1.0, %v390_v49 }
  0xfe   :  { %v392_v50 = vpop.eup %391 }
  0xff   :  { %v135_v53 = vadd.f32 1.0, %v392_v50  ;;  %v138_v56 = vmul.f32 %v136_v51, %v122_v54 }
 0x101   :  { %v137_v55 = vmul.f32 %v135_v53, %v121_v52 }
 0x103   :  { %383 = vmatprep.mubr.f32.mxu1 %v137_v55 }
 0x104   :  { %384 = vmatmul.mubr.f32.vlgmr.msra.gmra.mxu1 %v138_v56 }
 0x1c4   :  { %v385_v58 = vpop.f32.mrf.mxu1 }
 0x1c5   :  { %v259_v59 = vadd.f32 %v385_v58, %v279_v57 }
 0x1c6   :  { %v221_v60 = vpop.f32.mrf.mxu1 }
 0x1c7   :  { %261 = vst [vmem:[#allocation2 + $0x8] sm:$0xff] %v259_v59  ;;  %v258_v61 = vadd.f32 %v279_v57, %v221_v60 }
 0x1c9   :  { %260 = vst [vmem:[#allocation2] sm:$0xff] %v258_v61 }
 0x1ca   :  { %404 = shalt.err (!%p401_p4)
}
 0x1cb   :  { %s416_s12 = smov 128   ;;  %s417_s13 = smov 8  }
 0x1cc   :  { %273 = dma.vmem_to_hbm [thread:$0]  %s268_s10, 256, %s564_s5, [#allocation3], %s416_s12, %s416_s12, %s417_s13  }
 0x1cd   :  { %413 = dma.done.wait [#allocation3], 256  }
 0x1ce   :  { %414 = vsyncadd [#allocation3], 4294967040 }
 0x1cf   :  { %277 = vsyncpa [#allocation3], 1 }

</bundles_post_ra>
